<compile_context>
chip_gen: v7x
topology: tpu7x:2x2x1
jax: 0.10.0
libtpu: 0.0.40
codegen_flags: <defaults>
</compile_context>

<pallas_src>
import functools

import jax
import jax.numpy as jnp
from jax.experimental import pallas as pl
from jax.experimental.pallas import tpu as pltpu

_LANE = 128
_MAX_TILE_B = 1024


def _round_up(x, m):
    return (x + m - 1) // m * m


def _choose_tiling(B):
    """Pick (tile_b, b_pad) giving an even, minimally padded batch grid."""
    if B <= 256:
        n_tiles = 1                      # tiny batch: one grid step, no split
    elif B <= _MAX_TILE_B:
        n_tiles = 2                      # enable dual-TC split on v7x
    else:
        n_tiles = pl.cdiv(B, _MAX_TILE_B)
        n_tiles += n_tiles % 2           # even tile count => balanced dual-TC
    tile_b = _round_up(pl.cdiv(B, n_tiles), 16)   # 16 sublanes (bf16 output)
    b_pad = _round_up(B, tile_b)
    return tile_b, b_pad


def _actor_critic_kernel(x_ref, ws_ref, bs_ref, wh_ref, bh_ref, out_ref):
    """One batch tile of the fused forward pass.

    x_ref  : (TILE_B, OBS)    f32    observation tile (batch-padded only)
    ws_ref : (OBS, HID_P)     bf16   shared weights (lane padded, resident)
    bs_ref : (1, HID_P)       f32    shared bias
    wh_ref : (HID_P, OUT_P)   bf16   fused [actor | critic | 0-pad] head weights
    bh_ref : (1, OUT_P)       f32    fused head bias
    out_ref: (TILE_B, OUT_P)  bf16   lane-dense 128-wide output slab
    """
    # ---- shared network: Linear + ReLU (bf16 MXU matmul, f32 accumulate) ----
    x = x_ref[...].astype(jnp.bfloat16)          # free VPU cast under DMA slack
    h = jnp.dot(x, ws_ref[...], preferred_element_type=jnp.float32)
    h = jnp.maximum(h + bs_ref[...], 0.0)        # f32 elementwise (v5e-safe)

    # ---- fused actor+critic head: single 128-lane matmul, unmasked store ----
    out = jnp.dot(h.astype(jnp.bfloat16), wh_ref[...],
                  preferred_element_type=jnp.float32)
    out_ref[...] = (out + bh_ref[...]).astype(out_ref.dtype)


def prepare_params(params):
    """One-time host-side packing: lane-pad, fuse heads, cast MXU operands.

    Run once (outside the jitted forward); the returned tensors are what the
    kernel consumes every step.
    """
    ws, bs = params["w_shared"], params["b_shared"]
    wa, ba = params["w_actor"], params["b_actor"]
    wc, bc = params["w_critic"], params["b_critic"]
    obs_dim, hidden = ws.shape
    n_actions = wa.shape[1]
    n_heads = n_actions + 1                      # actor logits + critic value

    hid_p = _round_up(hidden, _LANE)
    out_p = _round_up(n_heads, _LANE)

    ws_p = jnp.zeros((obs_dim, hid_p), jnp.bfloat16)
    ws_p = ws_p.at[:, :hidden].set(ws.astype(jnp.bfloat16))
    bs_p = jnp.zeros((1, hid_p), jnp.float32).at[:, :hidden].set(bs)

    wh = jnp.concatenate([wa, wc], axis=1)       # (hidden, n_actions + 1)
    bh = jnp.concatenate([ba, bc], axis=1)       # (1, n_actions + 1)
    wh_p = jnp.zeros((hid_p, out_p), jnp.bfloat16)
    wh_p = wh_p.at[:hidden, :n_heads].set(wh.astype(jnp.bfloat16))
    bh_p = jnp.zeros((1, out_p), jnp.float32).at[:, :n_heads].set(bh)

    return {"ws_p": ws_p, "bs_p": bs_p, "wh_p": wh_p, "bh_p": bh_p}


def actor_critic_forward(x, packed, *, n_actions):
    """Fused forward of ActorCriticNetwork.

    x: (B, obs_dim) float32, packed: output of prepare_params().
    Returns (actor_logits (B, n_actions), value (B, 1)), both float32.
    """
    ws_p, bs_p = packed["ws_p"], packed["bs_p"]
    wh_p, bh_p = packed["wh_p"], packed["bh_p"]
    B, obs_dim = x.shape
    hid_p = ws_p.shape[1]
    out_p = wh_p.shape[1]
    n_heads = n_actions + 1

    tile_b, b_pad = _choose_tiling(B)
    x_p = x if b_pad == B else jnp.pad(x, ((0, b_pad - B), (0, 0)))

    grid = (b_pad // tile_b,)

    flops = 2 * b_pad * obs_dim * hid_p + 2 * b_pad * hid_p * out_p
    bytes_accessed = (b_pad * obs_dim * 4            # x (f32)
                      + ws_p.size * 2 + wh_p.size * 2
                      + bs_p.size * 4 + bh_p.size * 4
                      + b_pad * out_p * 2)           # bf16 output slab

    out = pl.pallas_call(
        _actor_critic_kernel,
        out_shape=jax.ShapeDtypeStruct((b_pad, out_p), jnp.bfloat16),
        grid_spec=pltpu.PrefetchScalarGridSpec(
            num_scalar_prefetch=0,
            grid=grid,
            in_specs=[
                pl.BlockSpec((tile_b, obs_dim), lambda i: (i, 0)),  # x batch tile
                pl.BlockSpec((obs_dim, hid_p), lambda i: (0, 0)),   # shared W (resident)
                pl.BlockSpec((1, hid_p), lambda i: (0, 0)),         # shared b (resident)
                pl.BlockSpec((hid_p, out_p), lambda i: (0, 0)),     # fused head W (resident)
                pl.BlockSpec((1, out_p), lambda i: (0, 0)),         # fused head b (resident)
            ],
            out_specs=pl.BlockSpec((tile_b, out_p), lambda i: (i, 0)),
        ),
        compiler_params=pltpu.CompilerParams(
            dimension_semantics=("parallel",),       # shard batch tiles across TCs
        ),
        cost_estimate=pl.CostEstimate(
            flops=flops, transcendentals=0, bytes_accessed=bytes_accessed),
    )(x_p, ws_p, bs_p, wh_p, bh_p)

    # Single slice of the slab, then split actor/critic from the small result.
    heads = out[:B, :n_heads].astype(jnp.float32)
    actor = heads[:, :n_actions]
    critic = heads[:, n_actions:]
    return actor, critic


def init_params(key, obs_dim, hidden, n_actions):
    """Deterministic synthetic parameter init (roughly PyTorch Linear uniform)."""
    ks = jax.random.split(key, 6)

    def uniform(k, shape, fan_in):
        bound = 1.0 / jnp.sqrt(fan_in)
        return jax.random.uniform(k, shape, jnp.float32, -bound, bound)

    return {
        # stored as (in, out), i.e. already transposed relative to torch's (out, in)
        "w_shared": uniform(ks[0], (obs_dim, hidden), obs_dim),
        "b_shared": uniform(ks[1], (1, hidden), obs_dim),
        "w_actor":  uniform(ks[2], (hidden, n_actions), hidden),
        "b_actor":  uniform(ks[3], (1, n_actions), hidden),
        "w_critic": uniform(ks[4], (hidden, 1), hidden),
        "b_critic": uniform(ks[5], (1, 1), hidden),
    }


def _reference_forward(x, p):
    h = jnp.maximum(x @ p["w_shared"] + p["b_shared"], 0.0)
    return h @ p["w_actor"] + p["b_actor"], h @ p["w_critic"] + p["b_critic"]


if __name__ == "__main__":
    key = jax.random.PRNGKey(0)
    k_x, k_p = jax.random.split(key)

    B, OBS, HIDDEN, N_ACT = 8, 32, 64, 4
    x = jax.random.normal(k_x, (B, OBS), jnp.float32)
    params = init_params(k_p, OBS, HIDDEN, N_ACT)

    # One-time packing (outside the jitted forward path).
    packed = jax.tree_util.tree_map(jax.block_until_ready, prepare_params(params))

    fwd = jax.jit(actor_critic_forward, static_argnames=("n_actions",))
    actor_out, critic_out = fwd(x, packed, n_actions=N_ACT)
    jax.block_until_ready((actor_out, critic_out))

    # sanity check against a plain-JAX f32 reference (bf16 MXU operands + bf16
    # output slab => loose tolerance)
    ref_a, ref_c = _reference_forward(x, params)
    assert actor_out.shape == (B, N_ACT) and critic_out.shape == (B, 1)
    assert jnp.allclose(actor_out, ref_a, atol=5e-2, rtol=5e-2), \
        float(jnp.max(jnp.abs(actor_out - ref_a)))
    assert jnp.allclose(critic_out, ref_c, atol=5e-2, rtol=5e-2), \
        float(jnp.max(jnp.abs(critic_out - ref_c)))

    # second check: batch large & non-aligned enough to exercise the multi-tile
    # parallel grid and minimal batch padding path (2 tiles of 528, pad 16 rows)
    B2 = 1040
    x2 = jax.random.normal(jax.random.PRNGKey(1), (B2, OBS), jnp.float32)
    a2, c2 = fwd(x2, packed, n_actions=N_ACT)
    jax.block_until_ready((a2, c2))
    ra2, rc2 = _reference_forward(x2, params)
    assert a2.shape == (B2, N_ACT) and c2.shape == (B2, 1)
    assert jnp.allclose(a2, ra2, atol=5e-2, rtol=5e-2)
    assert jnp.allclose(c2, rc2, atol=5e-2, rtol=5e-2)

    # TODO(synk): eval_action / reset depend on the actor head's distribution
    # object and stateful sub-modules; only forward() is implemented here.
    print("KERNEL_OK")
</pallas_src>

<mosaic_0001>
module attributes {stable_mosaic.version = 11 : i64} {
  func.func @_actor_critic_kernel(%arg0: i32, %arg1: memref<16x32xf32, #tpu.memory_space<vmem>>, %arg2: memref<32x128xbf16, #tpu.memory_space<vmem>>, %arg3: memref<1x128xf32, #tpu.memory_space<vmem>>, %arg4: memref<128x128xbf16, #tpu.memory_space<vmem>>, %arg5: memref<1x128xf32, #tpu.memory_space<vmem>>, %arg6: memref<16x128xbf16, #tpu.memory_space<vmem>>) attributes {dimension_semantics = [#tpu.dimension_semantics<parallel>], iteration_bounds = array<i64: 1>, scalar_prefetch = 0 : i64, scratch_operands = 0 : i64, tpu.core_type = #tpu.core_type<tc>, window_params = [{transform_indices = @transform_0, window_bounds = array<i64: 16, 32>}, {pipeline_mode = #tpu.pipeline_mode<synchronous>, transform_indices = @transform_1, window_bounds = array<i64: 32, 128>}, {pipeline_mode = #tpu.pipeline_mode<synchronous>, transform_indices = @transform_2, window_bounds = array<i64: 1, 128>}, {pipeline_mode = #tpu.pipeline_mode<synchronous>, transform_indices = @transform_3, window_bounds = array<i64: 128, 128>}, {pipeline_mode = #tpu.pipeline_mode<synchronous>, transform_indices = @transform_4, window_bounds = array<i64: 1, 128>}, {transform_indices = @transform_5, window_bounds = array<i64: 16, 128>}]} {
    %c0 = arith.constant 0 : index
    %c0_0 = arith.constant 0 : index
    %0 = vector.load %arg1[%c0, %c0_0] : memref<16x32xf32, #tpu.memory_space<vmem>>, vector<16x32xf32>
    %1 = arith.truncf %0 : vector<16x32xf32> to vector<16x32xbf16>
    %c0_1 = arith.constant 0 : index
    %c0_2 = arith.constant 0 : index
    %2 = vector.load %arg2[%c0_1, %c0_2] : memref<32x128xbf16, #tpu.memory_space<vmem>>, vector<32x128xbf16>
    %cst = arith.constant dense<0.000000e+00> : vector<16x128xf32>
    %3 = tpu.matmul %1, %2, %cst {dimension_numbers = #tpu.dot_dimension_numbers<[1], [0], [0], [1], [0, 0, 1, 1], [], []>} : vector<16x32xbf16>, vector<32x128xbf16>, vector<16x128xf32> -> vector<16x128xf32>
    %c0_3 = arith.constant 0 : index
    %c0_4 = arith.constant 0 : index
    %4 = vector.load %arg3[%c0_3, %c0_4] : memref<1x128xf32, #tpu.memory_space<vmem>>, vector<1x128xf32>
    %5 = vector.broadcast %4 : vector<1x128xf32> to vector<16x128xf32>
    %6 = arith.addf %3, %5 : vector<16x128xf32>
    %cst_5 = arith.constant 0.000000e+00 : f32
    %7 = vector.broadcast %cst_5 : f32 to vector<16x128xf32>
    %8 = arith.maximumf %6, %7 : vector<16x128xf32>
    %9 = arith.truncf %8 : vector<16x128xf32> to vector<16x128xbf16>
    %c0_6 = arith.constant 0 : index
    %c0_7 = arith.constant 0 : index
    %10 = vector.load %arg4[%c0_6, %c0_7] : memref<128x128xbf16, #tpu.memory_space<vmem>>, vector<128x128xbf16>
    %cst_8 = arith.constant dense<0.000000e+00> : vector<16x128xf32>
    %11 = tpu.matmul %9, %10, %cst_8 {dimension_numbers = #tpu.dot_dimension_numbers<[1], [0], [0], [1], [0, 0, 1, 1], [], []>} : vector<16x128xbf16>, vector<128x128xbf16>, vector<16x128xf32> -> vector<16x128xf32>
    %c0_9 = arith.constant 0 : index
    %c0_10 = arith.constant 0 : index
    %12 = vector.load %arg5[%c0_9, %c0_10] : memref<1x128xf32, #tpu.memory_space<vmem>>, vector<1x128xf32>
    %13 = vector.broadcast %12 : vector<1x128xf32> to vector<16x128xf32>
    %14 = arith.addf %11, %13 : vector<16x128xf32>
    %15 = arith.truncf %14 : vector<16x128xf32> to vector<16x128xbf16>
    %c0_11 = arith.constant 0 : index
    %c0_12 = arith.constant 0 : index
    %16 = vector.load %arg6[%c0_11, %c0_12] : memref<16x128xbf16, #tpu.memory_space<vmem>>, vector<16x128xbf16>
    tpu.vector_store %arg6[%c0_11, %c0_12], %15 {strides = array<i32>} : memref<16x128xbf16, #tpu.memory_space<vmem>>, vector<16x128xbf16>,
    return
  }
  func.func @transform_0(%arg0: i32) -> (i32, i32) {
    %c0_i32 = arith.constant 0 : i32
    %c0_i32_0 = arith.constant 0 : i32
    return %arg0, %c0_i32 : i32, i32
  }
  func.func @transform_1(%arg0: i32) -> (i32, i32) {
    %c0_i32 = arith.constant 0 : i32
    %c0_i32_0 = arith.constant 0 : i32
    %c0_i32_1 = arith.constant 0 : i32
    return %c0_i32, %c0_i32_0 : i32, i32
  }
  func.func @transform_2(%arg0: i32) -> (i32, i32) {
    %c0_i32 = arith.constant 0 : i32
    %c0_i32_0 = arith.constant 0 : i32
    %c0_i32_1 = arith.constant 0 : i32
    return %c0_i32, %c0_i32_0 : i32, i32
  }
  func.func @transform_3(%arg0: i32) -> (i32, i32) {
    %c0_i32 = arith.constant 0 : i32
    %c0_i32_0 = arith.constant 0 : i32
    %c0_i32_1 = arith.constant 0 : i32
    return %c0_i32, %c0_i32_0 : i32, i32
  }
  func.func @transform_4(%arg0: i32) -> (i32, i32) {
    %c0_i32 = arith.constant 0 : i32
    %c0_i32_0 = arith.constant 0 : i32
    %c0_i32_1 = arith.constant 0 : i32
    return %c0_i32, %c0_i32_0 : i32, i32
  }
  func.func @transform_5(%arg0: i32) -> (i32, i32) {
    %c0_i32 = arith.constant 0 : i32
    %c0_i32_0 = arith.constant 0 : i32
    return %arg0, %c0_i32 : i32, i32
  }
}

</mosaic_0001>

<bundles_post_ra>
// kernel: actor_critic_forward.1
= control target key start
LH: loop header
LB: loop body
LE: loop exit
PB: predicated region body
PF: predicated region fallthrough
CT: control target
= control target key end

     0   :  { %10 = vsyncpa [#allocation3], 0  ;;  %s337_s18 = smov [#allocation2]   ;;  %s405_s0 = inlined_call_operand.vmem [shape: f32[16,32], index: 0, kind: input, shape index: {}]   ;;  %s406_s1 = inlined_call_operand.vmem [shape: bf16[32,128], index: 1, kind: input, shape index: {}]   ;;  %s407_s2 = inlined_call_operand.vmem [shape: f32[1,128], index: 2, kind: input, shape index: {}]   ;;  %s408_s3 = inlined_call_operand.hbm [shape: bf16[128,128], index: 3, kind: input, shape index: {}]   ;;  %s409_s4 = inlined_call_operand.vmem [shape: f32[1,128], index: 4, kind: input, shape index: {}]   ;;  %s410_s5 = inlined_call_operand.vmem [shape: bf16[16,128], index: 5, kind: output, shape index: {}]  }
   0x1   :  { %s22_s19 = sshll.u32 %s337_s18, 4  ;;  %s313_s22 = scalar_lea.hbm %s408_s3, 1024  ;;  %s23_s19 = int_to_ptr.vmem [resolvable:$true] %s22_s19 }
   0x2   :  { %p314_p0 = scmp.ne.s32.totalorder %s408_s3, %s313_s22  ;;  %p317_p1 = scmp.lt.u32.totalorder %s313_s22, %s408_s3 }
   0x4   :  { %p319_p2 = pnand %p317_p1, %p314_p0 }
   0x6   :  { %322 = shalt.err (!%p319_p2)
}
   0x7   :  { %s323_s27 = scalar_lea.vmem %s23_s19, 1024  ;;  %p328_p4 = scmp.lt.s32.totalorder %s23_s19, %s23_s19 }
   0x8   :  { %p324_p3 = scmp.ne.s32.totalorder %s23_s19, %s323_s27  ;;  %p329_p5 = scmp.lt.s32.totalorder %s323_s27, %s323_s27 }
   0xa   :  { %p330_p6 = por %p329_p5, %p328_p4 }
   0xc   :  { %p331_p7 = pnand %p330_p6, %p324_p3 }
   0xe   :  { %334 = shalt.err (!%p331_p7)
}
   0xf   :  { %s338_s28 = smov 64   ;;  %s339_s29 = smov 4  }
  0x10   :  { %28 = dma.hbm_to_vmem [thread:$0]  %s408_s3, 1024, %s23_s19, [#allocation3], %s338_s28, %s338_s28, %s339_s29  }
  0x11   :  { %335 = dma.done.wait [#allocation3], 1024  }
  0x12   :  { %336 = vsyncadd [#allocation3], 4294966272  ;;  %v340_v0 = vmov 0.0   ;;  %vm341_vm0 = vmmov 0   ;;  %v303_v1 = vld [vmem:[%s406_s1] sm:$0xff]   ;;  %v304_v2 = vld [vmem:[%s406_s1 + $0x8] sm:$0xff]  }
  0x13   :  { %270 = vmatprep.subr.bf16.mxu0 %v340_v0  ;;  %274 = vmatprep.mubr.msk.bf16.mxu0 %vm341_vm0, %v340_v0  ;;  %v35_v3 = vld [vmem:[%s405_s0] sm:$0xff]  ;;  %v36_v4 = vld [vmem:[%s405_s0 + $0x8] sm:$0xff]  ;;  %vm61_vm1 = vcmask 261120   ;;  %v307_v8 = vld [vmem:[#allocation2 + $0x10] sm:$0xff]  }
  0x14   :  { %278 = vmatprep.subr.bf16.mxu1 %v340_v0  ;;  %294 = vmatprep.mubr.msk.bf16.mxu1 %vm341_vm0, %v340_v0  ;;  %v305_v5 = vld [vmem:[#allocation2] sm:$0xff]   ;;  %v37_v6 = vpack.c.bf16 %v36_v4, %v35_v3  ;;  %v306_v7 = vld [vmem:[#allocation2 + $0x8] sm:$0xff]   ;;  %v308_v9 = vld [vmem:[#allocation2 + $0x18] sm:$0xff]  }
  0x15   :  { %271 = vmatpush3.bf16.msra.mxu0 %v303_v1  ;;  %279 = vmatpush3.bf16.msra.mxu1 %v305_v5  ;;  %v309_v10 = vld [vmem:[#allocation2 + $0x20] sm:$0xff]   ;;  %v310_v11 = vld [vmem:[#allocation2 + $0x28] sm:$0xff]   ;;  %v311_v12 = vld [vmem:[#allocation2 + $0x30] sm:$0xff]  }
  0x16   :  { %272 = vmatprep.subr.bf16.mxu0 %v340_v0  ;;  %280 = vmatprep.subr.bf16.mxu1 %v340_v0  ;;  %v312_v13 = vld [vmem:[#allocation2 + $0x38] sm:$0xff]   ;;  %v236_v14 = vld [vmem:[%s407_s2] ss:$0 sm:$0xff] }
  0x17   :  { %v240_v24 = vld [vmem:[%s409_s4] ss:$0 sm:$0xff] }
  0x19   :  { %273 = vmatpush3.bf16.msra.mxu0 %v304_v2  ;;  %281 = vmatpush3.bf16.msra.mxu1 %v306_v7 }
  0x1a   :  { %282 = vmatprep.subr.bf16.mxu1 %v340_v0 }
  0x1c   :  { %275 = vmatmul.mubr.msk.bf16.vlgmr.msra.gmra.mrb[0].mxu0 %vm61_vm1, %v37_v6 }
  0x1d   :  { %283 = vmatpush3.bf16.msra.mxu1 %v307_v8 }
  0x1e   :  { %284 = vmatprep.subr.bf16.mxu1 %v340_v0 }
  0x21   :  { %285 = vmatpush3.bf16.msra.mxu1 %v308_v9 }
  0x22   :  { %286 = vmatprep.subr.bf16.mxu1 %v340_v0 }
  0x25   :  { %287 = vmatpush3.bf16.msra.mxu1 %v309_v10 }
  0x26   :  { %288 = vmatprep.subr.bf16.mxu1 %v340_v0 }
  0x29   :  { %289 = vmatpush3.bf16.msra.mxu1 %v310_v11 }
  0x2a   :  { %290 = vmatprep.subr.bf16.mxu1 %v340_v0 }
  0x2d   :  { %291 = vmatpush3.bf16.msra.mxu1 %v311_v12 }
  0x2e   :  { %292 = vmatprep.subr.bf16.mxu1 %v340_v0 }
  0x31   :  { %293 = vmatpush3.bf16.msra.mxu1 %v312_v13 }
  0xef   :  { %v99_v15 = vpop.f32.mrb[0].mxu0 }
  0xf0   :  { %v100_v16 = vadd.f32 %v236_v14, %v99_v15  ;;  %v276_v17 = vpop.f32.mrb[1].mxu0 }
  0xf1   :  { %v102_v18 = vpop.f32.mrb[2].mxu0 }
  0xf2   :  { %v103_v19 = vadd.f32 %v236_v14, %v102_v18  ;;  %v277_v20 = vpop.f32.mrb[3].mxu0  ;;  %v106_v21 = vmax.f32 %v100_v16, 0.0 }
  0xf4   :  { %v107_v22 = vmax.f32 %v103_v19, 0.0 }
  0xf6   :  { %v108_v23 = vpack.c.bf16 %v107_v22, %v106_v21 }
  0xf8   :  { %295 = vmatmul.mubr.bf16.vlgmr.msra.gmra.mrb[0].mxu1 %v108_v23 }
 0x1cb   :  { %v214_v25 = vpop.f32.mrb[0].mxu1 }
 0x1cc   :  { %v296_v26 = vpop.f32.mrb[1].mxu1  ;;  %v215_v28 = vadd.f32 %v240_v24, %v214_v25 }
 0x1cd   :  { %v217_v27 = vpop.f32.mrb[2].mxu1 }
 0x1ce   :  { %v218_v29 = vadd.f32 %v240_v24, %v217_v27  ;;  %v297_v30 = vpop.f32.mrb[3].mxu1 }
 0x1d0   :  { %v256_v31 = vpack.c.bf16 %v218_v29, %v215_v28 }
 0x1d2   :  { %257 = vst [vmem:[%s410_s5] sm:$0xff] %v256_v31  }
 0x1d3   :  { %235 = vsyncpa [#allocation3], 1 }

</bundles_post_ra>
